<compile_context>
chip_gen: v6e
topology: v6e:2x2x1
jax: 0.10.0
libtpu: 0.0.40
codegen_flags: <defaults>
</compile_context>

<pallas_src>
import functools

import jax
import jax.numpy as jnp
from jax.experimental import pallas as pl
from jax.experimental.pallas import tpu as pltpu


# Tile targets (MXU-friendly: 256-aligned N/K for v6e/v7x, fits comfortably in
# the 32 MiB scoped-VMEM default on every generation incl. v7x's 64 MiB chip).
TM_TARGET = 256
TN_TARGET = 512
TK_TARGET = 512
VMEM_LIMIT_BYTES = 32 * 1024 * 1024


def _pick_tile(dim, target, align):
    """Largest `align`-multiple tile <= target that divides dim, else full dim."""
    if dim <= target:
        return dim
    t = (target // align) * align
    while t >= align:
        if dim % t == 0:
            return t
        t -= align
    return dim  # fall back to full extent (always legal for BlockSpec)


# ----------------------------- Pallas kernels ------------------------------ #

def _gelu(y):
    # exact (erf-based) GELU, matching torch.nn.GELU default; kept in f32
    return 0.5 * y * (1.0 + jax.lax.erf(y * (2.0 ** -0.5)))


def _make_linear_kernel(has_res):
    """Tiled matmul: o = x @ w + b (+ residual). K-reduction accumulator."""

    def kernel(*refs):
        if has_res:
            x_ref, w_ref, b_ref, r_ref, o_ref, acc_ref = refs
        else:
            x_ref, w_ref, b_ref, o_ref, acc_ref = refs
            r_ref = None
        k = pl.program_id(2)

        @pl.when(k == 0)
        def _():
            acc_ref[...] = jnp.zeros_like(acc_ref)

        acc_ref[...] += jnp.dot(
            x_ref[...].astype(jnp.bfloat16),
            w_ref[...],                       # weights stored as bf16
            preferred_element_type=jnp.float32,
        )

        @pl.when(k == pl.num_programs(2) - 1)
        def _():
            y = acc_ref[...] + b_ref[...]
            if r_ref is not None:
                y = y + r_ref[...]
            o_ref[...] = y

    return kernel


def _make_ln_linear_kernel(has_bias, act):
    """Fused LayerNorm (eps=1e-5) + matmul (+ bias) (+ GELU). K is not tiled."""

    def kernel(*refs):
        if has_bias:
            x_ref, g_ref, bb_ref, w_ref, b_ref, o_ref = refs
        else:
            x_ref, g_ref, bb_ref, w_ref, o_ref = refs
            b_ref = None
        x = x_ref[...]
        mean = jnp.mean(x, axis=-1, keepdims=True)
        var = jnp.mean(jnp.square(x - mean), axis=-1, keepdims=True)
        h = (x - mean) * jax.lax.rsqrt(var + 1e-5) * g_ref[...] + bb_ref[...]
        y = jnp.dot(h.astype(jnp.bfloat16), w_ref[...],
                    preferred_element_type=jnp.float32)
        if b_ref is not None:
            y = y + b_ref[...]
        if act == "gelu":
            y = _gelu(y)
        o_ref[...] = y

    return kernel


def _attention_kernel(qkv_ref, o_ref, *, num_heads, scale):
    """All heads of one batch element.  qkv_ref: (1, S, 3D) -> o_ref: (1, S, D)."""
    qkv = qkv_ref[0]                       # (S, 3D) f32
    S, three_d = qkv.shape
    D = three_d // 3
    hd = D // num_heads
    outs = []
    for h in range(num_heads):
        lo = h * hd
        q = (qkv[:, lo:lo + hd] * scale).astype(jnp.bfloat16)        # scale on q
        k = qkv[:, D + lo:D + lo + hd].astype(jnp.bfloat16)
        v = qkv[:, 2 * D + lo:2 * D + lo + hd].astype(jnp.bfloat16)
        # contract last axes: q @ k^T without forming a transposed copy of k
        s = jax.lax.dot_general(q, k, (((1,), (1,)), ((), ())),
                                preferred_element_type=jnp.float32)   # (S, S)
        s = s - jnp.max(s, axis=-1, keepdims=True)
        p = jnp.exp(s)
        p = p * pl.reciprocal(jnp.sum(p, axis=-1, keepdims=True), approx=True)
        outs.append(jnp.dot(p.astype(jnp.bfloat16), v,
                            preferred_element_type=jnp.float32))      # (S, hd)
    o_ref[0] = jnp.concatenate(outs, axis=-1)


# ----------------------------- Pallas wrappers ------------------------------ #

def pallas_linear(x, w, b, residual=None):
    """x:(M,K) f32, w:(K,N) bf16, b:(N,) f32 [, residual:(M,N) f32] -> (M,N) f32."""
    M, K = x.shape
    N = w.shape[1]
    tm = _pick_tile(M, TM_TARGET, 8)
    tn = _pick_tile(N, TN_TARGET, 128)
    tk = _pick_tile(K, TK_TARGET, 128)
    has_res = residual is not None

    in_specs = [
        pl.BlockSpec((tm, tk), lambda i, j, k: (i, k)),
        pl.BlockSpec((tk, tn), lambda i, j, k: (k, j)),
        pl.BlockSpec((1, tn), lambda i, j, k: (0, j)),
    ]
    args = [x, w, b.reshape(1, N)]
    if has_res:
        in_specs.append(pl.BlockSpec((tm, tn), lambda i, j, k: (i, j)))
        args.append(residual)

    return pl.pallas_call(
        _make_linear_kernel(has_res),
        out_shape=jax.ShapeDtypeStruct((M, N), jnp.float32),
        grid=(M // tm, N // tn, K // tk),
        in_specs=in_specs,
        out_specs=pl.BlockSpec((tm, tn), lambda i, j, k: (i, j)),
        scratch_shapes=[pltpu.VMEM((tm, tn), jnp.float32)],
        compiler_params=pltpu.CompilerParams(
            dimension_semantics=("parallel", "parallel", "arbitrary"),
            vmem_limit_bytes=VMEM_LIMIT_BYTES),
    )(*args)


def pallas_ln_linear(x, g, bb, w, b=None, act=None):
    """Fused LayerNorm(x) @ w (+ b) (+ GELU).  K (=feature dim) is kept whole."""
    M, K = x.shape
    N = w.shape[1]
    tm = _pick_tile(M, TM_TARGET, 8)
    tn = _pick_tile(N, TN_TARGET, 128)
    has_bias = b is not None

    in_specs = [
        pl.BlockSpec((tm, K), lambda i, j: (i, 0)),
        pl.BlockSpec((1, K), lambda i, j: (0, 0)),
        pl.BlockSpec((1, K), lambda i, j: (0, 0)),
        pl.BlockSpec((K, tn), lambda i, j: (0, j)),
    ]
    args = [x, g.reshape(1, K), bb.reshape(1, K), w]
    if has_bias:
        in_specs.append(pl.BlockSpec((1, tn), lambda i, j: (0, j)))
        args.append(b.reshape(1, N))

    return pl.pallas_call(
        _make_ln_linear_kernel(has_bias, act),
        out_shape=jax.ShapeDtypeStruct((M, N), jnp.float32),
        grid=(M // tm, N // tn),
        in_specs=in_specs,
        out_specs=pl.BlockSpec((tm, tn), lambda i, j: (i, j)),
        compiler_params=pltpu.CompilerParams(
            dimension_semantics=("parallel", "parallel"),
            vmem_limit_bytes=VMEM_LIMIT_BYTES),
    )(*args)


def pallas_attention(qkv, num_heads, scale):
    """qkv: (B, S, 3D) packed projections -> (B, S, D) attention output."""
    B, S, three_d = qkv.shape
    D = three_d // 3
    kern = functools.partial(_attention_kernel, num_heads=num_heads, scale=scale)
    return pl.pallas_call(
        kern,
        out_shape=jax.ShapeDtypeStruct((B, S, D), jnp.float32),
        grid=(B,),
        in_specs=[pl.BlockSpec((1, S, three_d), lambda b: (b, 0, 0))],
        out_specs=pl.BlockSpec((1, S, D), lambda b: (b, 0, 0)),
        compiler_params=pltpu.CompilerParams(
            dimension_semantics=("parallel",),
            vmem_limit_bytes=VMEM_LIMIT_BYTES),
    )(qkv)


# ------------------------------- Model setup -------------------------------- #

def init_params(key, *, img_size, patch_size, in_chans, embed_dim, depth,
                num_heads, mlp_ratio, num_classes):
    num_patches = (img_size // patch_size) ** 2
    hidden = int(embed_dim * mlp_ratio)
    D = embed_dim
    std = 0.02

    def nrm(k, shape, s=std):
        return (jax.random.normal(k, shape, jnp.float32) * s).astype(jnp.float32)

    keys = jax.random.split(key, 8 + depth)
    params = {
        # conv weight flattened as (C*P*P, D): matches Conv2d(kernel=stride=P)
        "patch_w": nrm(keys[0], (in_chans * patch_size * patch_size, D)),
        "patch_b": jnp.zeros((D,), jnp.float32),
        "tokens": nrm(keys[1], (1, 2, D)),                       # cls + distill token
        "pos_embed": nrm(keys[2], (1, num_patches + 2, D)),
        "norm_g": jnp.ones((D,), jnp.float32),
        "norm_b": jnp.zeros((D,), jnp.float32),
        "cls_w": nrm(keys[3], (D, num_classes)),
        "cls_b": jnp.zeros((num_classes,), jnp.float32),
        "dst_w": nrm(keys[4], (D, num_classes)),
        "dst_b": jnp.zeros((num_classes,), jnp.float32),
        "blocks": [],
    }
    for i in range(depth):
        bk = jax.random.split(keys[8 + i], 4)
        params["blocks"].append({
            "ln1_g": jnp.ones((D,), jnp.float32),
            "ln1_b": jnp.zeros((D,), jnp.float32),
            "qkv_w": nrm(bk[0], (D, 3 * D)),     # qkv_bias=False -> no bias at all
            "proj_w": nrm(bk[1], (D, D)),
            "proj_b": jnp.zeros((D,), jnp.float32),
            "ln2_g": jnp.ones((D,), jnp.float32),
            "ln2_b": jnp.zeros((D,), jnp.float32),
            "fc1_w": nrm(bk[2], (D, hidden)),
            "fc1_b": jnp.zeros((hidden,), jnp.float32),
            "fc2_w": nrm(bk[3], (hidden, D)),
            "fc2_b": jnp.zeros((D,), jnp.float32),
        })
    return params


def prepare_params(params):
    """One-time prep: cast matmul weights to bf16, merge the two classifier heads."""
    bf = lambda a: a.astype(jnp.bfloat16)
    p = {
        "patch_w": bf(params["patch_w"]), "patch_b": params["patch_b"],
        "tokens": params["tokens"], "pos_embed": params["pos_embed"],
        "norm_g": params["norm_g"], "norm_b": params["norm_b"],
        "head_w": bf(jnp.concatenate([params["cls_w"], params["dst_w"]], axis=1)),
        "head_b": jnp.concatenate([params["cls_b"], params["dst_b"]], axis=0),
        "blocks": [],
    }
    for blk in params["blocks"]:
        p["blocks"].append({
            "ln1_g": blk["ln1_g"], "ln1_b": blk["ln1_b"],
            "qkv_w": bf(blk["qkv_w"]),
            "proj_w": bf(blk["proj_w"]), "proj_b": blk["proj_b"],
            "ln2_g": blk["ln2_g"], "ln2_b": blk["ln2_b"],
            "fc1_w": bf(blk["fc1_w"]), "fc1_b": blk["fc1_b"],
            "fc2_w": bf(blk["fc2_w"]), "fc2_b": blk["fc2_b"],
        })
    return p


def deit_forward(params, x, *, patch_size, num_heads):
    """x: (B, C, H, W) NCHW.  Returns (cls_pred, dst_pred), each (B, num_classes)."""
    B, C, H, W = x.shape
    P = patch_size
    D = params["tokens"].shape[-1]
    nh, nw = H // P, W // P

    # --- patch embed: Conv2d(k=P, stride=P) as patch-extract + tiled matmul ---
    # TODO(synk): patch extraction itself is an XLA reshape/transpose (one extra
    # HBM pass); could be folded into the patch-embed kernel via Element specs.
    patches = (
        x.reshape(B, C, nh, P, nw, P)
        .transpose(0, 2, 4, 1, 3, 5)                 # (B, nh, nw, C, P, P)
        .reshape(B * nh * nw, C * P * P)
    )
    emb = pallas_linear(patches, params["patch_w"], params["patch_b"])
    xs = emb.reshape(B, nh * nw, D)

    # --- tokens + positional embedding (pos_drop: p=0 -> identity) ---
    tokens = jnp.broadcast_to(params["tokens"], (B, 2, D))
    xs = jnp.concatenate([tokens, xs], axis=1) + params["pos_embed"]

    S = xs.shape[1]
    hd = D // num_heads
    scale = hd ** -0.5

    # residual stream kept in f32 as (B*S, D)
    x2 = xs.reshape(B * S, D)

    # --- transformer blocks (drop_path / dropout = 0 -> identity) ---
    for blk in params["blocks"]:
        # attention sub-block:  LN1 fused into qkv matmul (no bias, qkv_bias=False)
        qkv = pallas_ln_linear(x2, blk["ln1_g"], blk["ln1_b"], blk["qkv_w"])
        attn = pallas_attention(qkv.reshape(B, S, 3 * D), num_heads, scale)
        # output projection with residual add fused in
        x2 = pallas_linear(attn.reshape(B * S, D), blk["proj_w"], blk["proj_b"],
                           residual=x2)

        # MLP sub-block: LN2 + fc1 + GELU fused; fc2 with residual add fused
        h = pallas_ln_linear(x2, blk["ln2_g"], blk["ln2_b"], blk["fc1_w"],
                             blk["fc1_b"], act="gelu")
        x2 = pallas_linear(h, blk["fc2_w"], blk["fc2_b"], residual=x2)

    # --- final norm fused with the merged (cls | distill) classifier matmul ---
    # (LayerNorm is row-wise, so norming only the 2 token rows == norm-then-slice)
    nc2 = params["head_w"].shape[1]
    ncls = nc2 // 2
    tok = x2.reshape(B, S, D)[:, 0:2].reshape(2 * B, D)
    head = pallas_ln_linear(tok, params["norm_g"], params["norm_b"],
                            params["head_w"], params["head_b"])
    head = head.reshape(B, 2, nc2)
    cls_pred = head[:, 0, :ncls]
    dst_pred = head[:, 1, ncls:]
    return cls_pred, dst_pred


# ---------------------------------- main ------------------------------------ #

if __name__ == "__main__":
    IMG, PATCH, CIN = 16, 4, 3
    EMBED, DEPTH, HEADS = 32, 2, 4
    MLP_RATIO, NUM_CLASSES, BATCH = 4.0, 10, 2

    key = jax.random.PRNGKey(0)
    k_param, k_input = jax.random.split(key)

    params = init_params(
        k_param, img_size=IMG, patch_size=PATCH, in_chans=CIN, embed_dim=EMBED,
        depth=DEPTH, num_heads=HEADS, mlp_ratio=MLP_RATIO, num_classes=NUM_CLASSES,
    )
    params = prepare_params(params)
    x = jax.random.normal(k_input, (BATCH, CIN, IMG, IMG), jnp.float32)

    cls_pred, dst_pred = deit_forward(params, x, patch_size=PATCH, num_heads=HEADS)
    jax.block_until_ready((cls_pred, dst_pred))

    assert cls_pred.shape == (BATCH, NUM_CLASSES)
    assert dst_pred.shape == (BATCH, NUM_CLASSES)
    print("KERNEL_OK")
</pallas_src>

<mosaic_0001>
module attributes {stable_mosaic.version = 11 : i64} {
  func.func @kernel(%arg0: i32, %arg1: i32, %arg2: i32, %arg3: memref<32x48xf32, #tpu.memory_space<vmem>>, %arg4: memref<48x32xbf16, #tpu.memory_space<vmem>>, %arg5: memref<1x32xf32, #tpu.memory_space<vmem>>, %arg6: memref<32x32xf32, #tpu.memory_space<vmem>>, %arg7: memref<32x32xf32, #tpu.memory_space<vmem>>) attributes {dimension_semantics = [#tpu.dimension_semantics<parallel>, #tpu.dimension_semantics<parallel>, #tpu.dimension_semantics<arbitrary>], iteration_bounds = array<i64: 1, 1, 1>, scalar_prefetch = 0 : i64, scratch_operands = 1 : i64, tpu.core_type = #tpu.core_type<tc>, window_params = [{transform_indices = @transform_0, window_bounds = array<i64: 32, 48>}, {transform_indices = @transform_1, window_bounds = array<i64: 48, 32>}, {transform_indices = @transform_2, window_bounds = array<i64: 1, 32>}, {transform_indices = @transform_3, window_bounds = array<i64: 32, 32>}]} {
    %c0_i32 = arith.constant 0 : i32
    %0 = arith.cmpi eq, %arg2, %c0_i32 : i32
    %1 = arith.extui %0 : i1 to i32
    %c0_i32_0 = arith.constant 0 : i32
    %2 = arith.cmpi ne, %1, %c0_i32_0 : i32
    scf.if %2 {
      %cst_10 = arith.constant 0.000000e+00 : f32
      %13 = vector.broadcast %cst_10 : f32 to vector<32x32xf32>
      %c0_11 = arith.constant 0 : index
      %c0_12 = arith.constant 0 : index
      %14 = vector.load %arg7[%c0_11, %c0_12] : memref<32x32xf32, #tpu.memory_space<vmem>>, vector<32x32xf32>
      tpu.vector_store %arg7[%c0_11, %c0_12], %13 {strides = array<i32>} : memref<32x32xf32, #tpu.memory_space<vmem>>, vector<32x32xf32>,
    } else {
    }
    %c0 = arith.constant 0 : index
    %c0_1 = arith.constant 0 : index
    %3 = vector.load %arg7[%c0, %c0_1] : memref<32x32xf32, #tpu.memory_space<vmem>>, vector<32x32xf32>
    %c0_2 = arith.constant 0 : index
    %c0_3 = arith.constant 0 : index
    %4 = vector.load %arg3[%c0_2, %c0_3] : memref<32x48xf32, #tpu.memory_space<vmem>>, vector<32x48xf32>
    %5 = arith.truncf %4 : vector<32x48xf32> to vector<32x48xbf16>
    %c0_4 = arith.constant 0 : index
    %c0_5 = arith.constant 0 : index
    %6 = vector.load %arg4[%c0_4, %c0_5] : memref<48x32xbf16, #tpu.memory_space<vmem>>, vector<48x32xbf16>
    %cst = arith.constant dense<0.000000e+00> : vector<32x32xf32>
    %7 = tpu.matmul %5, %6, %cst {dimension_numbers = #tpu.dot_dimension_numbers<[1], [0], [0], [1], [0, 0, 1, 1], [], []>} : vector<32x48xbf16>, vector<48x32xbf16>, vector<32x32xf32> -> vector<32x32xf32>
    %8 = arith.addf %3, %7 : vector<32x32xf32>
    %c0_6 = arith.constant 0 : index
    %c0_7 = arith.constant 0 : index
    %9 = vector.load %arg7[%c0_6, %c0_7] : memref<32x32xf32, #tpu.memory_space<vmem>>, vector<32x32xf32>
    tpu.vector_store %arg7[%c0_6, %c0_7], %8 {strides = array<i32>} : memref<32x32xf32, #tpu.memory_space<vmem>>, vector<32x32xf32>,
    %c0_i32_8 = arith.constant 0 : i32
    %10 = arith.cmpi eq, %arg2, %c0_i32_8 : i32
    %11 = arith.extui %10 : i1 to i32
    %c0_i32_9 = arith.constant 0 : i32
    %12 = arith.cmpi ne, %11, %c0_i32_9 : i32
    scf.if %12 {
      %c0_10 = arith.constant 0 : index
      %c0_11 = arith.constant 0 : index
      %13 = vector.load %arg7[%c0_10, %c0_11] : memref<32x32xf32, #tpu.memory_space<vmem>>, vector<32x32xf32>
      %c0_12 = arith.constant 0 : index
      %c0_13 = arith.constant 0 : index
      %14 = vector.load %arg5[%c0_12, %c0_13] : memref<1x32xf32, #tpu.memory_space<vmem>>, vector<1x32xf32>
      %15 = vector.broadcast %14 : vector<1x32xf32> to vector<32x32xf32>
      %16 = arith.addf %13, %15 : vector<32x32xf32>
      %c0_14 = arith.constant 0 : index
      %c0_15 = arith.constant 0 : index
      %17 = vector.load %arg6[%c0_14, %c0_15] : memref<32x32xf32, #tpu.memory_space<vmem>>, vector<32x32xf32>
      tpu.vector_store %arg6[%c0_14, %c0_15], %16 {strides = array<i32>} : memref<32x32xf32, #tpu.memory_space<vmem>>, vector<32x32xf32>,
    } else {
    }
    return
  }
  func.func @transform_0(%arg0: i32, %arg1: i32, %arg2: i32) -> (i32, i32) {
    %c0_i32 = arith.constant 0 : i32
    return %arg0, %arg2 : i32, i32
  }
  func.func @transform_1(%arg0: i32, %arg1: i32, %arg2: i32) -> (i32, i32) {
    %c0_i32 = arith.constant 0 : i32
    return %arg2, %arg1 : i32, i32
  }
  func.func @transform_2(%arg0: i32, %arg1: i32, %arg2: i32) -> (i32, i32) {
    %c0_i32 = arith.constant 0 : i32
    %c0_i32_0 = arith.constant 0 : i32
    return %c0_i32, %arg1 : i32, i32
  }
  func.func @transform_3(%arg0: i32, %arg1: i32, %arg2: i32) -> (i32, i32) {
    %c0_i32 = arith.constant 0 : i32
    return %arg0, %arg1 : i32, i32
  }
}

</mosaic_0001>

<bundles_post_ra>
// kernel: tpu_custom_call.1
= control target key start
LH: loop header
LB: loop body
LE: loop exit
PB: predicated region body
PF: predicated region fallthrough
CT: control target
= control target key end

     0   :  { %vm20_vm0 = vcmask 261120   ;;  %vm59_vm1 = vcmask 392192   ;;  %v212_v4 = vmov 0.0   ;;  %s277_s0 = inlined_call_operand.vmem [shape: f32[32,48], index: 0, kind: input, shape index: {}]   ;;  %s278_s1 = inlined_call_operand.vmem [shape: bf16[48,32], index: 1, kind: input, shape index: {}]   ;;  %s279_s2 = inlined_call_operand.vmem [shape: f32[1,32], index: 2, kind: input, shape index: {}]   ;;  %s280_s3 = inlined_call_operand.hbm [shape: f32[32,32], index: 3, kind: output, shape index: {}]  }
   0x1   :  { %v187_v0 = vld [vmem:[%s278_s1 + $0x10] sm:$0xff]   ;;  %v188_v1 = vld [vmem:[%s278_s1 + $0x8] sm:$0xff]   ;;  %v29_v2 = vld [vmem:[%s277_s0] sm:$0xff]  ;;  %23 = vst.msk [vmem:[#allocation2 + $0x10] sm:$0xff] %vm20_vm0, %v212_v4 }
   0x2   :  { %173 = vmatprep.subr.bf16.mxu0 %v187_v0  ;;  %v30_v3 = vld [vmem:[%s277_s0 + $0x8] sm:$0xff]  ;;  %21 = vst.msk [vmem:[#allocation2] sm:$0xff] %vm20_vm0, %v212_v4  ;;  %22 = vst.msk [vmem:[#allocation2 + $0x8] sm:$0xff] %vm20_vm0, %v212_v4  ;;  %v189_v5 = vld [vmem:[%s278_s1] sm:$0xff]  }
   0x3   :  { %174 = vmatpush3.bf16.msra.mxu0 %v187_v0  ;;  %24 = vst.msk [vmem:[#allocation2 + $0x18] sm:$0xff] %vm20_vm0, %v212_v4  ;;  %v33_v6 = vpack.c.bf16 %v30_v3, %v29_v2 }
   0x4   :  { %175 = vmatprep.subr.bf16.mxu0 %v188_v1 }
   0x5   :  { %8 = vsyncpa [#allocation4], 0  ;;  %179 = vmatprep.mubr.msk.bf16.mxu0 %vm59_vm1, %v33_v6  ;;  %v31_v7 = vld [vmem:[%s277_s0 + $0x10] sm:$0xff]  ;;  %v32_v8 = vld [vmem:[%s277_s0 + $0x18] sm:$0xff]  ;;  %s213_s26 = smov [#allocation3]  }
   0x6   :  { %v34_v9 = vpack.c.bf16 %v32_v8, %v31_v7  ;;  %v167_v22 = vld [vmem:[%s279_s2] ss:$0 sm:$0xff]  ;;  %s151_s27 = sshll.u32 %s213_s26, 4  ;;  %s152_s27 = int_to_ptr.vmem [resolvable:$true] %s151_s27 }
   0x7   :  { %176 = vmatpush3.bf16.msra.mxu0 %v188_v1  ;;  %s190_s2 = scalar_lea.vmem %s152_s27, 512  ;;  %p195_p1 = scmp.lt.s32.totalorder %s152_s27, %s152_s27 }
   0x8   :  { %177 = vmatprep.subr.bf16.mxu0 %v189_v5  ;;  %v27_v10 = vld [vmem:[#allocation2 + $0x10] sm:$0xff]  ;;  %p191_p0 = scmp.ne.s32.totalorder %s152_s27, %s190_s2  ;;  %p196_p2 = scmp.lt.s32.totalorder %s190_s2, %s190_s2 }
   0x9   :  { %v25_v12 = vld [vmem:[#allocation2] sm:$0xff]  ;;  %v26_v18 = vld [vmem:[#allocation2 + $0x8] sm:$0xff] }
   0xa   :  { %v28_v15 = vld [vmem:[#allocation2 + $0x18] sm:$0xff]  ;;  %p197_p3 = por %p196_p2, %p195_p1 }
   0xb   :  { %178 = vmatpush3.bf16.msra.mxu0 %v189_v5 }
   0xc   :  { %p198_p4 = pnand %p197_p3, %p191_p0 }
   0xe   :  { %180 = vmatmul.mubr.msk.bf16.vlgmr.msra.gmra.mxu0 %vm59_vm1, %v34_v9 }
  0xce   :  { %v181_v11 = vpop.f32.mrf.mxu0 }
  0xcf   :  { %v117_v13 = vadd.f32 %v181_v11, %v27_v10 }
  0xd0   :  { %v100_v14 = vpop.f32.mrf.mxu0 }
  0xd1   :  { %122 = vst.msk [vmem:[#allocation2 + $0x10] sm:$0xff] %vm20_vm0, %v117_v13  ;;  %v115_v16 = vadd.f32 %v100_v14, %v25_v12 }
  0xd2   :  { %v182_v17 = vpop.f32.mrf.mxu0 }
  0xd3   :  { %120 = vst.msk [vmem:[#allocation2] sm:$0xff] %vm20_vm0, %v115_v16  ;;  %v118_v19 = vadd.f32 %v182_v17, %v28_v15 }
  0xd4   :  { %v103_v20 = vpop.f32.mrf.mxu0 }
  0xd5   :  { %123 = vst.msk [vmem:[#allocation2 + $0x18] sm:$0xff] %vm20_vm0, %v118_v19  ;;  %v116_v21 = vadd.f32 %v103_v20, %v26_v18 }
  0xd7   :  { %121 = vst.msk [vmem:[#allocation2 + $0x8] sm:$0xff] %vm20_vm0, %v116_v21 }
  0xd8   :  { %v129_v23 = vld [vmem:[#allocation2 + $0x10] sm:$0xff] }
  0xd9   :  { %v140_v24 = vadd.f32 %v167_v22, %v129_v23 }
  0xda   :  { %v127_v25 = vld [vmem:[#allocation2] sm:$0xff] }
  0xdb   :  { %v138_v26 = vadd.f32 %v167_v22, %v127_v25  ;;  %144 = vst.msk [vmem:[#allocation3 + $0x10] sm:$0xff] %vm20_vm0, %v140_v24 }
  0xdc   :  { %v130_v27 = vld [vmem:[#allocation2 + $0x18] sm:$0xff] }
  0xdd   :  { %v141_v28 = vadd.f32 %v167_v22, %v130_v27  ;;  %142 = vst.msk [vmem:[#allocation3] sm:$0xff] %vm20_vm0, %v138_v26 }
  0xde   :  { %v128_v29 = vld [vmem:[#allocation2 + $0x8] sm:$0xff] }
  0xdf   :  { %v139_v30 = vadd.f32 %v167_v22, %v128_v29  ;;  %145 = vst.msk [vmem:[#allocation3 + $0x18] sm:$0xff] %vm20_vm0, %v141_v28 }
  0xe1   :  { %143 = vst.msk [vmem:[#allocation3 + $0x8] sm:$0xff] %vm20_vm0, %v139_v30 }
  0xe2   :  { %201 = shalt.err (!%p198_p4)
}
  0xe3   :  { %s214_s28 = smov 128   ;;  %s215_s29 = smov 8  }
  0xe4   :  { %157 = dma.vmem_to_hbm [thread:$0]  %s152_s27, 512, %s280_s3, [#allocation4], %s214_s28, %s214_s28, %s215_s29  }
  0xe5   :  { %210 = dma.done.wait [#allocation4], 512  }
  0xe6   :  { %211 = vsyncadd [#allocation4], 4294966784 }
  0xe7   :  { %161 = vsyncpa [#allocation4], 1 }

</bundles_post_ra>
